<compile_context>
chip_gen: v6e
topology: v6e:2x2x1
jax: 0.10.0
libtpu: 0.0.40
codegen_flags: <defaults>
</compile_context>

<pallas_src>
import functools

import jax
import jax.numpy as jnp
from jax.experimental import pallas as pl
from jax.experimental.pallas import tpu as pltpu

LANE = 128
ROWS_PER_BLOCK = 2048   # 2048 x 128 f32 = 1 MiB per input tile
NUM_CORES = 2           # leading "parallel" axis (2 TCs on v7x; harmless on 1-TC chips)


def _mae_kernel(out_ref, tgt_ref, res_ref, *, rows, block_rows, blocks_per_core):
    """out_ref/tgt_ref: (block_rows, LANE) input tiles (any float dtype).

    res_ref: (1, 2, LANE) per-core lane-wise partials [sum_abs, sum_mask],
    resident in VMEM across the inner ("arbitrary") grid axis."""
    c = pl.program_id(0)   # core / partial-sum slot
    b = pl.program_id(1)   # streaming block within this core's range

    @pl.when(b == 0)
    def _():
        res_ref[...] = jnp.zeros_like(res_ref)

    tgt = tgt_ref[...].astype(jnp.float32)
    out = out_ref[...].astype(jnp.float32)

    # Global row index of each element. Masks out:
    #  (a) the ragged tail of the last real block, and
    #  (b) duplicated blocks when num_blocks % NUM_CORES != 0 (the input
    #      index_map clamps those to the last real block).
    blk = c * blocks_per_core + b
    row_ids = blk * block_rows + jax.lax.broadcasted_iota(jnp.int32, tgt.shape, 0)
    valid = jnp.logical_and(tgt != 0.0, row_ids < rows)

    diff = jnp.where(valid, jnp.abs(tgt - out), 0.0)
    cnt = jnp.where(valid, 1.0, 0.0)

    # Per-lane partial sums (VPU adds only for the bulk of the reduction);
    # the expensive cross-lane reduction happens exactly once, in the wrapper.
    update = jnp.concatenate(
        [jnp.sum(diff, axis=0, keepdims=True),
         jnp.sum(cnt, axis=0, keepdims=True)],
        axis=0,
    )  # (2, LANE)
    res_ref[...] = res_ref[...] + update[None]


def mae_loss(outputs, target):
    """outputs, target: same shape (e.g. NCHW). Returns scalar f32 MAE over
    nonzero-target pixels. Returns NaN if target is all zeros (matches the
    PyTorch reference, which also divides by zero)."""
    assert outputs.shape == target.shape
    out_f = jnp.ravel(outputs)
    tgt_f = jnp.ravel(target)
    n = out_f.shape[0]

    # Pad only when strictly necessary to reach a LANE multiple (<=127 elems);
    # padded target == 0 -> excluded by the mask.
    rem = n % LANE
    if rem:
        out_f = jnp.pad(out_f, (0, LANE - rem))
        tgt_f = jnp.pad(tgt_f, (0, LANE - rem))

    rows = out_f.shape[0] // LANE
    out2 = out_f.reshape(rows, LANE)
    tgt2 = tgt_f.reshape(rows, LANE)

    # Big streaming tiles; if the whole input is smaller than one tile, use the
    # full array extent (always a legal block shape).
    block_rows = rows if rows < ROWS_PER_BLOCK else ROWS_PER_BLOCK
    num_blocks = pl.cdiv(rows, block_rows)
    blocks_per_core = pl.cdiv(num_blocks, NUM_CORES)

    def in_map(c, b):
        # Clamp so the DMA never targets a fully out-of-range block; the
        # in-kernel row mask zeroes any duplicated block's contribution.
        return (jnp.minimum(c * blocks_per_core + b, num_blocks - 1), 0)

    kernel = functools.partial(
        _mae_kernel,
        rows=rows,
        block_rows=block_rows,
        blocks_per_core=blocks_per_core,
    )

    partial = pl.pallas_call(
        kernel,
        out_shape=jax.ShapeDtypeStruct((NUM_CORES, 2, LANE), jnp.float32),
        grid_spec=pltpu.PrefetchScalarGridSpec(
            num_scalar_prefetch=0,
            grid=(NUM_CORES, blocks_per_core),
            in_specs=[
                pl.BlockSpec((block_rows, LANE), in_map),
                pl.BlockSpec((block_rows, LANE), in_map),
            ],
            out_specs=pl.BlockSpec((1, 2, LANE), lambda c, b: (c, 0, 0)),
        ),
        compiler_params=pltpu.CompilerParams(
            dimension_semantics=("parallel", "arbitrary"),
        ),
    )(out2, tgt2)

    # Single cross-lane / cross-core reduce + divide (tiny: (2, 2, 128)).
    sums = jnp.sum(partial, axis=(0, 2))  # [sum_abs, sum_mask]
    return sums[0] / sums[1]


def mae_loss_ref(outputs, target):
    val = (target != 0).astype(jnp.float32)
    loss = target * val - outputs * val
    return jnp.sum(jnp.abs(loss)) / jnp.sum(val)


if __name__ == "__main__":
    key = jax.random.PRNGKey(0)
    k1, k2, k3 = jax.random.split(key, 3)
    # Small NCHW-like shapes consistent with a depth-prediction loss.
    shape = (2, 4, 16, 16)
    outputs = jax.random.normal(k1, shape, dtype=jnp.float32)
    target = jax.random.normal(k2, shape, dtype=jnp.float32)
    # Make some target pixels exactly zero (invalid pixels), like sparse depth.
    zero_mask = jax.random.bernoulli(k3, p=0.3, shape=shape)
    target = jnp.where(zero_mask, 0.0, target)

    got = jax.block_until_ready(mae_loss(outputs, target))
    want = jax.block_until_ready(mae_loss_ref(outputs, target))
    assert jnp.allclose(got, want, rtol=1e-5, atol=1e-6), (got, want)
    print("KERNEL_OK")
</pallas_src>

<mosaic_0001>
module attributes {stable_mosaic.version = 11 : i64} {
  func.func @_mae_kernel(%arg0: i32, %arg1: i32, %arg2: memref<16x128xf32, #tpu.memory_space<vmem>>, %arg3: memref<16x128xf32, #tpu.memory_space<vmem>>, %arg4: memref<1x2x128xf32, #tpu.memory_space<vmem>>) attributes {dimension_semantics = [#tpu.dimension_semantics<parallel>, #tpu.dimension_semantics<arbitrary>], iteration_bounds = array<i64: 2, 1>, scalar_prefetch = 0 : i64, scratch_operands = 0 : i64, tpu.core_type = #tpu.core_type<tc>, window_params = [{transform_indices = @transform_0, window_bounds = array<i64: 16, 128>}, {transform_indices = @transform_1, window_bounds = array<i64: 16, 128>}, {transform_indices = @transform_2, window_bounds = array<i64: 1, 2, 128>}]} {
    %c0_i32 = arith.constant 0 : i32
    %0 = arith.cmpi eq, %arg1, %c0_i32 : i32
    %1 = arith.extui %0 : i1 to i32
    %c0_i32_0 = arith.constant 0 : i32
    %2 = arith.cmpi ne, %1, %c0_i32_0 : i32
    scf.if %2 {
      %cst_16 = arith.constant 0.000000e+00 : f32
      %32 = vector.broadcast %cst_16 : f32 to vector<1x2x128xf32>
      %c0_17 = arith.constant 0 : index
      %c0_18 = arith.constant 0 : index
      %c0_19 = arith.constant 0 : index
      %33 = vector.load %arg4[%c0_17, %c0_18, %c0_19] : memref<1x2x128xf32, #tpu.memory_space<vmem>>, vector<1x2x128xf32>
      tpu.vector_store %arg4[%c0_17, %c0_18, %c0_19], %32 {strides = array<i32>} : memref<1x2x128xf32, #tpu.memory_space<vmem>>, vector<1x2x128xf32>,
    } else {
    }
    %c0 = arith.constant 0 : index
    %c0_1 = arith.constant 0 : index
    %3 = vector.load %arg3[%c0, %c0_1] : memref<16x128xf32, #tpu.memory_space<vmem>>, vector<16x128xf32>
    %c0_2 = arith.constant 0 : index
    %c0_3 = arith.constant 0 : index
    %4 = vector.load %arg2[%c0_2, %c0_3] : memref<16x128xf32, #tpu.memory_space<vmem>>, vector<16x128xf32>
    %c1_i32 = arith.constant 1 : i32
    %5 = arith.muli %arg0, %c1_i32 : i32
    %6 = arith.addi %5, %arg1 : i32
    %c16_i32 = arith.constant 16 : i32
    %7 = arith.muli %6, %c16_i32 : i32
    %8 = tpu.iota {dimensions = array<i32: 0>} : vector<16x128xi32>
    %9 = vector.broadcast %7 : i32 to vector<16x128xi32>
    %10 = arith.addi %9, %8 : vector<16x128xi32>
    %cst = arith.constant 0.000000e+00 : f32
    %11 = vector.broadcast %cst : f32 to vector<16x128xf32>
    %12 = arith.cmpf one, %3, %11 : vector<16x128xf32>
    %c16_i32_4 = arith.constant 16 : i32
    %13 = vector.broadcast %c16_i32_4 : i32 to vector<16x128xi32>
    %14 = arith.cmpi slt, %10, %13 : vector<16x128xi32>
    %15 = arith.andi %12, %14 : vector<16x128xi1>
    %16 = arith.subf %3, %4 : vector<16x128xf32>
    %17 = math.absf %16 : vector<16x128xf32>
    %cst_5 = arith.constant 0.000000e+00 : f32
    %18 = vector.broadcast %cst_5 : f32 to vector<16x128xf32>
    %19 = arith.select %15, %17, %18 : vector<16x128xi1>, vector<16x128xf32>
    %cst_6 = arith.constant 1.000000e+00 : f32
    %cst_7 = arith.constant 0.000000e+00 : f32
    %20 = vector.broadcast %cst_6 : f32 to vector<16x128xf32>
    %21 = vector.broadcast %cst_7 : f32 to vector<16x128xf32>
    %22 = arith.select %15, %20, %21 : vector<16x128xi1>, vector<16x128xf32>
    %cst_8 = arith.constant dense<0.000000e+00> : vector<128xf32>
    %23 = vector.multi_reduction <add>, %19, %cst_8 [0] : vector<16x128xf32> to vector<128xf32>
    %24 = vector.shape_cast %23 : vector<128xf32> to vector<1x128xf32>
    %cst_9 = arith.constant dense<0.000000e+00> : vector<128xf32>
    %25 = vector.multi_reduction <add>, %22, %cst_9 [0] : vector<16x128xf32> to vector<128xf32>
    %26 = vector.shape_cast %25 : vector<128xf32> to vector<1x128xf32>
    %27 = tpu.concatenate %24, %26 in 0 : vector<1x128xf32>, vector<1x128xf32> -> vector<2x128xf32>
    %c0_10 = arith.constant 0 : index
    %c0_11 = arith.constant 0 : index
    %c0_12 = arith.constant 0 : index
    %28 = vector.load %arg4[%c0_10, %c0_11, %c0_12] : memref<1x2x128xf32, #tpu.memory_space<vmem>>, vector<1x2x128xf32>
    %29 = vector.shape_cast %27 : vector<2x128xf32> to vector<1x2x128xf32>
    %30 = arith.addf %28, %29 : vector<1x2x128xf32>
    %c0_13 = arith.constant 0 : index
    %c0_14 = arith.constant 0 : index
    %c0_15 = arith.constant 0 : index
    %31 = vector.load %arg4[%c0_13, %c0_14, %c0_15] : memref<1x2x128xf32, #tpu.memory_space<vmem>>, vector<1x2x128xf32>
    tpu.vector_store %arg4[%c0_13, %c0_14, %c0_15], %30 {strides = array<i32>} : memref<1x2x128xf32, #tpu.memory_space<vmem>>, vector<1x2x128xf32>,
    return
  }
  func.func @transform_0(%arg0: i32, %arg1: i32) -> (i32, i32) {
    %c1_i32 = arith.constant 1 : i32
    %0 = arith.muli %arg0, %c1_i32 : i32
    %1 = arith.addi %0, %arg1 : i32
    %c0_i32 = arith.constant 0 : i32
    %2 = arith.minsi %1, %c0_i32 : i32
    %c0_i32_0 = arith.constant 0 : i32
    %c0_i32_1 = arith.constant 0 : i32
    return %2, %c0_i32_0 : i32, i32
  }
  func.func @transform_1(%arg0: i32, %arg1: i32) -> (i32, i32) {
    %c1_i32 = arith.constant 1 : i32
    %0 = arith.muli %arg0, %c1_i32 : i32
    %1 = arith.addi %0, %arg1 : i32
    %c0_i32 = arith.constant 0 : i32
    %2 = arith.minsi %1, %c0_i32 : i32
    %c0_i32_0 = arith.constant 0 : i32
    %c0_i32_1 = arith.constant 0 : i32
    return %2, %c0_i32_0 : i32, i32
  }
  func.func @transform_2(%arg0: i32, %arg1: i32) -> (i32, i32, i32) {
    %c0_i32 = arith.constant 0 : i32
    %c0_i32_0 = arith.constant 0 : i32
    %c0_i32_1 = arith.constant 0 : i32
    return %arg0, %c0_i32, %c0_i32_0 : i32, i32, i32
  }
}

</mosaic_0001>

<bundles_post_ra>
// kernel: tpu_custom_call.1
= control target key start
LH: loop header
LB: loop body
LE: loop exit
PB: predicated region body
PF: predicated region fallthrough
CT: control target
= control target key end

     0   :  { %7 = vsyncpa [#allocation3], 0  ;;  %s893_s0 = inlined_call_operand.hbm [shape: f32[16,128], index: 0, kind: input, shape index: {}]   ;;  %s894_s1 = inlined_call_operand.hbm [shape: f32[16,128], index: 1, kind: input, shape index: {}]   ;;  %s895_s2 = inlined_call_operand.hbm [shape: f32[2,2,128], index: 2, kind: output, shape index: {}]  }
   0x1   :  { %9 = vsyncpa [#allocation3 + $0x1], 0 }
   0x2   :  { %10 = vsyncpa [#allocation6], 0 }
   0x3   :  { %12 = vsyncpa [#allocation6 + $0x1], 0 }
   0x4   :  { %13 = vsyncpa [#allocation4], 0 }
   0x5   :  { %15 = vsyncpa [#allocation4 + $0x1], 0  ;;  %s704_s9 = smov 0   ;;  %s706_s10 = smov 0  }
   0x6   :  { %s708_s11 = smov 0   ;;  %s710_s12 = smov 0  }
   0x7   :  { %s712_s13 = smov 0   ;;  %s714_s14 = smov 0  }
   0x8   :  { %s716_s15 = smov 0   ;;  %s718_s16 = smov 0  }
   0x9 LB: > { %s405_s17 = sadd.s32 4294967295, %s681_s16   ;;  %s406_s18 = sadd.s32 4294967294, %s681_s16   ;;  %s681_s16 = sphi %s718_s16, %s21_s16   ;;  %s677_s15 = sphi %s716_s15, %s914_s15   ;;  %s673_s14 = sphi %s714_s14, %s913_s14   ;;  %s669_s13 = sphi %s712_s13, %s883_s13   ;;  %s665_s12 = sphi %s710_s12, %s912_s12   ;;  %s661_s11 = sphi %s708_s11, %s911_s11   ;;  %s657_s10 = sphi %s706_s10, %s910_s10   ;;  %s653_s9 = sphi %s704_s9, %s909_s9  }
   0xa   : > { %s33_s19 = sadd.s32 1, %s677_s15  ;;  %p650_p1 = scmp.ne.s32.totalorder %s669_s13, 0 }
   0xb   : > { %p35_p0 = scmp.ge.s32.totalorder %s33_s19, 2  ;;  %p54_p2 = scmp.eq.s32.totalorder %s681_s16, 0 }
   0xc   : > { %p59_p3 = scmp.ne.s32.totalorder %s669_s13, %s665_s12  ;;  %p60_p5 = scmp.eq.s32.totalorder %s405_s17, 0 }
   0xd   : > { %s916_s19 = smov (%p35_p0, %s33_s19), 0  ;;  %p750_p4 = por %p650_p1, %p54_p2 }
   0xe   : > { %p754_p6 = por %p60_p5, %p59_p3  ;;  %s101_s22 = ssub.s32 %s677_s15, %s916_s19 }
   0xf   : > { %p102_p7 = scmp.eq.s32.totalorder %s101_s22, 0  ;;  %s104_s23 = sadd.s32 1, %s661_s11 }
  0x10   : > { %s899_s21 = scalar_select %p754_p6, 1, 0 }
  0x11   : > { %s762_s24 = scalar_select %p102_p7, %s661_s11, %s104_s23  }
  0x12   : > { %p114_p8 = scmp.ne.s32.totalorder %s661_s11, %s657_s10  ;;  %p115_p9 = scmp.eq.s32.totalorder %s405_s17, 1 }
  0x13   : > { %p120_p10 = scmp.ne.s32.totalorder %s657_s10, %s653_s9  ;;  %p121_p11 = scmp.eq.s32.totalorder %s406_s18, 1 }
  0x14   : > { %p768_p12 = por %p115_p9, %p114_p8  ;;  %p443_p1 = scmp.lt.s32.totalorder %s681_s16, 2 }
  0x15   : > { %p773_p0 = por %p121_p11, %p120_p10  ;;  %s683_s27 = smov [#allocation2]  }
  0x16   : > { %s900_s25 = scalar_select %p768_p12, 1, 0 }
  0x17   : > { %s901_s26 = scalar_select %p773_p0, 1, 0 }
  0x18   : > { %s155_s28 = sshll.u32 %s683_s27, 4  ;;  %p780_p2 = pnand %p443_p1, %p750_p4  ;;  %s156_s28 = int_to_ptr.vmem [resolvable:$true] %s155_s28 }
  0x19   : > { %s520_s4 = scalar_lea.hbm %s893_s0, 256 }
  0x1a   : > { %p521_p3 = scmp.ne.s32.totalorder %s893_s0, %s520_s4  ;;  %p522_p5 = pneg %p780_p2 }
  0x1b   : > { %p527_p8 = scmp.lt.s32.totalorder %s520_s4, %s520_s4 }
  0x1c   : > { %p523_p7 = pnand %p522_p5, %p521_p3 }
  0x1e   : > { %p524_p4 = pneg %p523_p7 }
  0x20   : > { %p529_p9 = pnand %p527_p8, %p524_p4 }
  0x22   : > { %532 = shalt.err (!%p529_p9)
}
  0x23   : > { %s533_s7 = scalar_lea.vmem %s156_s28, 256  ;;  %s540_s8 = scalar_lea.vmem %s156_s28, 512 }
  0x24   : > { %p534_p10 = scmp.ne.s32.totalorder %s156_s28, %s533_s7  ;;  %p541_p13 = scmp.lt.s32.totalorder %s156_s28, %s156_s28 }
  0x25   : > { %p542_p0 = scmp.lt.s32.totalorder %s540_s8, %s533_s7 }
  0x26   : > { %p536_p11 = pnand %p534_p10, %p522_p5 }
  0x27   : > { %p543_p12 = por %p542_p0, %p541_p13 }
  0x28   : > { %p537_p1 = pneg %p536_p11 }
  0x2a   : > { %p544_p6 = pnand %p543_p12, %p537_p1 }
  0x2c   : > { %547 = shalt.err (!%p544_p6)
}
  0x2d   : > { %s684_s12 = smov 128   ;;  %s685_s17 = smov 8  }
  0x2e   : > { %435 = dma.hbm_to_vmem [thread:$0]  (!%p780_p2), %s893_s0, 256, %s156_s28, [#allocation3], %s684_s12, %s684_s12, %s685_s17  }
  0x2f   : > { %p415_p3 = scmp.ge.s32.totalorder %s681_s16, 1  ;;  %p187_p7 = scmp.lt.s32.totalorder %s681_s16, 3 }
  0x30   : > { %s686_s23 = smov [#allocation5]   ;;  %s548_s4 = scalar_lea.hbm %s894_s1, 256 }
  0x31   : > { %p805_p4 = pnand %p415_p3, %p187_p7  ;;  %s179_s27 = sshll.u32 %s686_s23, 4  ;;  %s180_s27 = int_to_ptr.vmem [resolvable:$true] %s179_s27 }
  0x32   : > { %p549_p6 = scmp.ne.s32.totalorder %s894_s1, %s548_s4  ;;  %p555_p0 = scmp.lt.s32.totalorder %s548_s4, %s548_s4 }
  0x33   : > { %s903_s22 = scalar_select %p805_p4, 1, 0 }
  0x34   : > { %p551_p12 = pnand %p549_p6, %p522_p5 }
  0x36   : > { %p552_p13 = pneg %p551_p12 }
  0x38   : > { %p557_p8 = pnand %p555_p0, %p552_p13 }
  0x3a   : > { %560 = shalt.err (!%p557_p8)
}
  0x3b   : > { %s561_s28 = scalar_lea.vmem %s180_s27, 256  ;;  %s568_s7 = scalar_lea.vmem %s180_s27, 512 }
  0x3c   : > { %p562_p9 = scmp.ne.s32.totalorder %s180_s27, %s561_s28  ;;  %p569_p1 = scmp.lt.s32.totalorder %s180_s27, %s180_s27 }
  0x3d   : > { %p570_p3 = scmp.lt.s32.totalorder %s568_s7, %s561_s28 }
  0x3e   : > { %p564_p10 = pnand %p562_p9, %p522_p5 }
  0x3f   : > { %p571_p7 = por %p570_p3, %p569_p1 }
  0x40   : > { %p565_p11 = pneg %p564_p10 }
  0x42   : > { %p572_p4 = pnand %p571_p7, %p565_p11 }
  0x44   : > { %575 = shalt.err (!%p572_p4)
}
  0x45   : > { %438 = dma.hbm_to_vmem [thread:$0]  (!%p780_p2), %s894_s1, 256, %s180_s27, [#allocation6], %s684_s12, %s684_s12, %s685_s17  }
  0x46   : > { %p904_p6 = scmp.ne.s32.totalorder %s903_s22, 0 }
  0x47   : > { %s193_s20 = sand.u32 (!%p904_p6), 1, %s669_s13   ;;  %p905_p5 = scmp.ne.s32.totalorder (!%p904_p6), %s899_s21, 0 }
  0x48   : > { %191 = sbr.rel (%p904_p6) target bundleno = 121 (0x79), region = 28  ;;  %s416_s23 = sshll.u32 (!%p904_p6), %s193_s20, 4 }
  0x49   : > { %s194_s30 = scalar_lea.sflag (!%p904_p6), [#allocation3], %s193_s20  ;;  %s197_s3 = scalar_lea.vmem (!%p904_p6), [#allocation2], %s416_s23 }
  0x4d   : > { %639 = dma.done.wait (%p905_p5), %s194_s30, 256  }
  0x4e   : > { %641 = vsyncadd (%p905_p5), %s194_s30, 4294967040  ;;  %s203_s29 = scalar_lea.sflag [#allocation6], %s193_s20  ;;  %s206_s4 = scalar_lea.vmem [#allocation5], %s416_s23 }
  0x4f   : > { %643 = dma.done.wait (%p905_p5), %s203_s29, 256  }
  0x50   : > { %645 = vsyncadd (%p905_p5), %s203_s29, 4294967040  ;;  %s229_s12 = sand.u32 1, %s657_s10   ;;  %s419_s17 = sshll.u32 %s673_s14, 4  ;;  %v251_v0 = vlaneseq  ;;  %v687_v3 = vmov 0.0   ;;  %v245_v7 = vld [vmem:[%s206_s4] sm:$0xff]  ;;  %v246_v8 = vld [vmem:[%s206_s4 + $0x8] sm:$0xff] }
  0x51   : > { %s418_s22 = sshll.u32 %s229_s12, 1  ;;  %v254_v1 = vstv %s419_s17  ;;  %v247_v9 = vld [vmem:[%s197_s3] sm:$0xff]  ;;  %v248_v10 = vld [vmem:[%s197_s3 + $0x8] sm:$0xff]  ;;  %vm257_vm1 = vcmp.ne.f32.partialorder %v245_v7, 0.0  ;;  %vm258_vm2 = vcmp.ne.f32.partialorder %v246_v8, 0.0  ;;  %vm285_vm6 = vcmask 1040384  }
  0x52   : > { %v252_v2 = vshrl.u32 %v251_v0, 7  ;;  %s841_s27 = scalar_lea.vmem [#allocation7], %s418_s22  ;;  %v263_v11 = vsub.f32 %v245_v7, %v247_v9  ;;  %v264_v12 = vsub.f32 %v246_v8, %v248_v10  ;;  %s421_s21 = sshll.u32 %s673_s14, 5 }
  0x53   : > { %244 = vst [vmem:[%s841_s27] sm:$0x3] %v687_v3  ;;  %s304_s5 = sshll.u32 %s841_s27, 4  ;;  %s302_s7 = scalar_lea.hbm %s895_s2, %s421_s21  ;;  %s305_s5 = int_to_ptr.vmem [resolvable:$true] %s304_s5 }
  0x54   : > { %v253_v4 = vadd.s32 8, %v252_v2  ;;  %v255_v5 = vadd.s32 %v254_v1, %v252_v2  ;;  %v265_v13 = vand.u32 2147483647, %v263_v11  ;;  %v266_v15 = vand.u32 2147483647, %v264_v12  ;;  %s291_s8 = scalar_lea.sflag [#allocation4], %s229_s12 }
  0x55   : > { %s576_s18 = scalar_lea.vmem %s305_s5, 32  ;;  %p906_p4 = scmp.ne.s32.totalorder %s900_s25, 0 }
  0x56   : > { %v256_v6 = vadd.s32 %v254_v1, %v253_v4  ;;  %vm259_vm0 = vcmp.lt.s32.totalorder %v255_v5, 16  ;;  %p577_p2 = scmp.ne.s32.totalorder %s305_s5, %s576_s18  ;;  %s688_s20 = smov [#allocation7]  }
  0x57   : > { %vm261_vm4 = vmand %vm257_vm1, %vm259_vm0  ;;  %s580_s23 = sshll.u32 %s688_s20, 4  ;;  %s581_s23 = int_to_ptr.vmem [resolvable:$false] %s580_s23 }
  0x58   : > { %vm260_vm3 = vcmp.lt.s32.totalorder %v256_v6, 16  ;;  %v269_v14 = vsel %vm261_vm4, 1.0, %v687_v3  ;;  %v267_v17 = vsel %vm261_vm4, %v265_v13, 0.0  ;;  %p578_p12 = pnand %p577_p2, %p906_p4  ;;  %s582_s14 = scalar_lea.vmem %s581_s23, 64 }
  0x59   : > { %vm262_vm5 = vmand %vm258_vm2, %vm260_vm3  ;;  %p583_p0 = scmp.lt.s32.totalorder %s305_s5, %s581_s23  ;;  %p584_p8 = scmp.lt.s32.totalorder %s582_s14, %s576_s18 }
  0x5a   : > { %v270_v16 = vsel %vm262_vm5, 1.0, %v687_v3  ;;  %v268_v19 = vsel %vm262_vm5, %v266_v15, 0.0  ;;  %v287_v33 = vld [vmem:[%s841_s27] sm:$0x3]  ;;  %p579_p13 = pneg %p578_p12 }
  0x5b   : > { %v278_v18 = vadd.f32 %v270_v16, %v269_v14  ;;  %v271_v20 = vadd.f32 %v268_v19, %v267_v17  ;;  %p585_p9 = por %p584_p8, %p583_p0 }
  0x5d   : > { %v279_v21 = vrot.slane %v278_v18, 4  ;;  %v272_v22 = vrot.slane %v271_v20, 4  ;;  %p586_p10 = pnand %p585_p9, %p579_p13 }
  0x5f   : > { %v280_v23 = vadd.f32 %v279_v21, %v278_v18  ;;  %v273_v24 = vadd.f32 %v272_v22, %v271_v20 }
  0x61   : > { %v281_v25 = vrot.slane %v280_v23, 2  ;;  %v274_v26 = vrot.slane %v273_v24, 2 }
  0x63   : > { %v282_v27 = vadd.f32 %v281_v25, %v280_v23  ;;  %v275_v28 = vadd.f32 %v274_v26, %v273_v24 }
  0x65   : > { %v283_v29 = vrot.slane %v282_v27, 1  ;;  %v276_v30 = vrot.slane %v275_v28, 1 }
  0x67   : > { %v284_v31 = vadd.f32 %v283_v29, %v282_v27  ;;  %v277_v32 = vadd.f32 %v276_v30, %v275_v28 }
  0x69   : > { %v286_v34 = vsel %vm285_vm6, %v277_v32, %v284_v31 }
  0x6a   : > { %v288_v35 = vadd.f32 %v287_v33, %v286_v34 }
  0x6c   : > { %289 = vst [vmem:[%s841_s27] sm:$0x3] %v288_v35 }
  0x6d   : > { %589 = shalt.err (!%p586_p10)
}
  0x6e   : > { %s590_s30 = scalar_lea.hbm %s302_s7, 32  ;;  %s594_s4 = scalar_lea.hbm %s895_s2, 64 }
  0x6f   : > { %p591_p11 = scmp.ne.s32.totalorder %s302_s7, %s590_s30  ;;  %p595_p7 = scmp.lt.s32.totalorder %s302_s7, %s895_s2 }
  0x70   : > { %p596_p6 = scmp.lt.s32.totalorder %s594_s4, %s590_s30 }
  0x71   : > { %p592_p1 = pnand %p591_p11, %p906_p4 }
  0x72   : > { %p597_p5 = por %p596_p6, %p595_p7 }
  0x73   : > { %p593_p3 = pneg %p592_p1 }
  0x75   : > { %p598_p2 = pnand %p597_p5, %p593_p3 }
  0x77   : > { %601 = shalt.err (!%p598_p2)
}
  0x78   : > { %430 = dma.vmem_to_hbm [thread:$0]  (%p906_p4), %s305_s5, 32, %s302_s7, %s291_s8  }
  0x79 PF: > { %s316_s22 = sand.u32 1, %s653_s9   ;;  %p907_p12 = scmp.ne.s32.totalorder %s901_s26, 0 }
  0x7a   : > { %p908_p13 = scmp.ge.s32.totalorder %s681_s16, 2  ;;  %s317_s27 = scalar_lea.sflag [#allocation4], %s316_s22 }
  0x7c   : > { %p440_p0 = pnand %p908_p13, %p907_p12 }
  0x7e   : > { %p441_p8 = pneg %p440_p0 }
  0x80   : > { %647 = dma.done.wait (%p441_p8), %s317_s27, 32  }
  0x81   : > { %649 = vsyncadd (%p441_p8), %s317_s27, 4294967264  ;;  %s21_s16 = sadd.s32 1, %s681_s16   ;;  %s909_s9 = smov %s657_s10 }
  0x82   : > { %p18_p9 = scmp.ge.s32.totalorder %s21_s16, 4   ;;  %s910_s10 = smov %s661_s11 }
  0x83   : > { %s911_s11 = smov %s762_s24  ;;  %s912_s12 = smov %s669_s13 }
  0x84   : > { %s883_s13 = smov 0   ;;  %s913_s14 = smov %s677_s15 }
  0x85   : > { %s914_s15 = smov %s916_s19  ;;  %20 = sbr.rel (!%p18_p9) target bundleno = 9 (0x9), region = 90 }
  0x8a   :  { %322 = vsyncpa [#allocation3], 1 }
  0x8b   :  { %324 = vsyncpa [#allocation3 + $0x1], 1 }
  0x8c   :  { %325 = vsyncpa [#allocation6], 1 }
  0x8d   :  { %327 = vsyncpa [#allocation6 + $0x1], 1 }
  0x8e   :  { %328 = vsyncpa [#allocation4], 1 }
  0x8f   :  { %330 = vsyncpa [#allocation4 + $0x1], 1 }

</bundles_post_ra>
